<compile_context>
chip_gen: v7x
topology: tpu7x:2x2x1
jax: 0.10.0
libtpu: 0.0.40
codegen_flags: <defaults>
</compile_context>

<pallas_src>
import math

import jax
import jax.numpy as jnp
from jax import lax
from jax.experimental import pallas as pl
from jax.experimental.pallas import tpu as pltpu


def _round_up(n, m):
    return ((n + m - 1) // m) * m


# ----------------------------- Pallas kernel -------------------------------
def gmm_logprob_kernel(x_ref, hbp_ref, mhbp_ref, const_ref, o_ref):
    x = x_ref[...]              # (tB, dim)  streamed batch tile, f32
    hbp = hbp_ref[...]          # (Kp, dim)  halfbeta            (padded rows = 0)
    mhbp = mhbp_ref[...]        # (Kp, dim)  mean * halfbeta     (padded rows = 0)
    constk = const_ref[...]     # (Kp, 1)    per-component const (padded rows = -1e30)

    # Contract the latent dim of both operands (A @ B^T pattern -> MXU).
    dn = (((1,), (1,)), ((), ()))
    quad = lax.dot_general(hbp, x * x, dn, preferred_element_type=jnp.float32)
    quad = quad - 2.0 * lax.dot_general(mhbp, x, dn,
                                        preferred_element_type=jnp.float32)
    # y[k,b] = pi_term + betafactor*sum(logbeta_k) + log_softmax(w)_k
    #          - sum_d hb[k,d]*(x[b,d]-mean[k,d])^2
    y = constk - quad                                   # (Kp, tB), dense vregs

    # logsumexp over the mixture components (sublane axis).
    m = jnp.max(y, axis=0, keepdims=True)               # (1, tB)
    s = jnp.sum(jnp.exp(y - m), axis=0, keepdims=True)  # (1, tB)
    o_ref[...] = m + jnp.log(s)                         # lane-dense store


# ----------------------------- plain-JAX glue -------------------------------
def compute_prior(mean, logbeta, *, Nmix, dim, radius, a, sd0, sd1, alpha=1.0):
    """log prob of prior on mean, logbeta and mixture coefficients (scalar)."""
    dirichlet_constant = math.lgamma(Nmix * alpha) - Nmix * math.lgamma(alpha)
    softball_norm = (math.lgamma(1.0 + dim * 0.5)
                     - dim * (math.log(radius) + 0.5 * math.log(math.pi)))
    norms = jnp.sqrt(jnp.sum(mean * mean, axis=-1))
    p_mean = jnp.sum(softball_norm
                     - jnp.log(1.0 + jnp.exp(a * (norms / radius - 1.0))))
    mu0 = -2.0 * math.log(sd0)
    p_lb = jnp.sum(-0.5 * ((logbeta - mu0) / sd1) ** 2
                   - math.log(sd1) - 0.5 * math.log(2.0 * math.pi))
    # alpha == 1 so the (alpha-1)*log(mixture_probs) term vanishes (as in torch code)
    return dirichlet_constant + p_mean + p_lb


def gaussian_mixture_forward(x, mean, logbeta, weight, *, betafactor,
                             radius, a, sd0, sd1, tB=512):
    B, dim = x.shape
    K = mean.shape[0]
    pi_term = -0.5 * dim * math.log(2.0 * math.pi)

    x = x.astype(jnp.float32)
    mean = mean.astype(jnp.float32)
    logbeta = logbeta.astype(jnp.float32)
    weight = weight.astype(jnp.float32)

    halfbeta = 0.5 * jnp.exp(logbeta)                         # (K, dim)
    mhb = mean * halfbeta                                     # (K, dim)
    log_w = jax.nn.log_softmax(weight, axis=0)                # (K,)
    const = (pi_term + betafactor * jnp.sum(logbeta, axis=-1) + log_w
             - jnp.sum(mean * mean * halfbeta, axis=-1))      # (K,)

    # Pad the mixture axis up to a sublane tile (multiple of 8).  Padded
    # components have zero beta rows and a huge negative constant, so
    # exp(y - m) == 0 and they drop out of the logsumexp.
    Kp = _round_up(K, 8)
    hbp = jnp.zeros((Kp, dim), jnp.float32).at[:K].set(halfbeta)
    mhbp = jnp.zeros((Kp, dim), jnp.float32).at[:K].set(mhb)
    constp = jnp.full((Kp, 1), -1e30, jnp.float32).at[:K, 0].set(const)

    # Batch tile: multiple of 128 (lane-dense output), default 512, shrunk for
    # tiny batches.  Pad B up to a multiple of tB (same as pl.cdiv + tail pad).
    tB = _round_up(max(128, min(tB, _round_up(B, 128))), 128)
    B_pad = _round_up(B, tB)
    if B_pad != B:
        x = jnp.pad(x, ((0, B_pad - B), (0, 0)))
    n_tiles = B_pad // tB

    cost = pl.CostEstimate(
        flops=4 * B_pad * Kp * dim + 8 * B_pad * Kp,
        transcendentals=B_pad * Kp + B_pad,
        bytes_accessed=B_pad * dim * 4 + 2 * Kp * dim * 4 + Kp * 4 + B_pad * 4)

    out = pl.pallas_call(
        gmm_logprob_kernel,
        out_shape=jax.ShapeDtypeStruct((1, B_pad), jnp.float32),
        grid=(n_tiles,),
        in_specs=[
            pl.BlockSpec((tB, dim), lambda i: (i, 0)),   # x tile (streamed)
            pl.BlockSpec((Kp, dim), lambda i: (0, 0)),   # halfbeta (resident)
            pl.BlockSpec((Kp, dim), lambda i: (0, 0)),   # mean*halfbeta (resident)
            pl.BlockSpec((Kp, 1), lambda i: (0, 0)),     # per-component const
        ],
        out_specs=pl.BlockSpec((1, tB), lambda i: (0, i)),
        compiler_params=pltpu.CompilerParams(dimension_semantics=("parallel",)),
        cost_estimate=cost,
    )(x, hbp, mhbp, constp)

    prior = compute_prior(mean, logbeta, Nmix=K, dim=dim, radius=radius,
                          a=a, sd0=sd0, sd1=sd1)
    return out[0, :B] + prior


# -------------------- deterministic parameter init (no .pt) -----------------
def init_gaussian_mixture(key, Nmix, dim, mean_init=(1.0, 1.0), sd_init=(1.0, 1.0)):
    """type='diagonal' GaussianMixture parameters, mirroring init_params()."""
    radius, a = mean_init
    sd0 = 0.2 * (radius / Nmix)      # module overwrites sd_init[0]
    sd1 = sd_init[1]
    k1, k2 = jax.random.split(key)
    # softball.sample(Nmix): approximate uniform in the dim-ball of given radius
    g = jax.random.normal(k1, (Nmix, dim), dtype=jnp.float32)
    g = g / jnp.sqrt(jnp.sum(g * g, axis=-1, keepdims=True))
    u = jax.random.uniform(k2, (Nmix, 1), dtype=jnp.float32)
    mean = g * (radius * jnp.power(u, 1.0 / dim))
    logbeta = jnp.full((Nmix, dim), -2.0 * math.log(sd0), dtype=jnp.float32)
    weight = jnp.ones((Nmix,), dtype=jnp.float32)
    return mean, logbeta, weight, radius, a, sd0, sd1


# ------------------------------ reference -----------------------------------
def reference_forward(x, mean, logbeta, weight, *, betafactor, radius, a, sd0, sd1):
    dim = x.shape[-1]
    pi_term = -0.5 * dim * math.log(2.0 * math.pi)
    halfbeta = 0.5 * jnp.exp(logbeta)
    y = (pi_term
         - jnp.sum((x[:, None, :] - mean[None, :, :]) ** 2 * halfbeta[None, :, :], -1)
         + betafactor * jnp.sum(logbeta, -1))
    y = y + jax.nn.log_softmax(weight, axis=0)
    y = jax.scipy.special.logsumexp(y, axis=-1)
    prior = compute_prior(mean, logbeta, Nmix=mean.shape[0], dim=dim,
                          radius=radius, a=a, sd0=sd0, sd1=sd1)
    return y + prior


if __name__ == "__main__":
    Nmix, dim, B = 8, 32, 16
    betafactor = 0.5   # type='diagonal'

    key = jax.random.PRNGKey(0)
    kp, kx = jax.random.split(key)
    mean, logbeta, weight, radius, a, sd0, sd1 = init_gaussian_mixture(kp, Nmix, dim)
    x = jax.random.normal(kx, (B, dim), dtype=jnp.float32)

    y = gaussian_mixture_forward(x, mean, logbeta, weight, betafactor=betafactor,
                                 radius=radius, a=a, sd0=sd0, sd1=sd1)
    y = jax.block_until_ready(y)

    y_ref = reference_forward(x, mean, logbeta, weight, betafactor=betafactor,
                              radius=radius, a=a, sd0=sd0, sd1=sd1)
    assert y.shape == (B,)
    assert jnp.allclose(y, y_ref, rtol=1e-4, atol=1e-4), (y, y_ref)
    print("KERNEL_OK")
</pallas_src>

<mosaic_0001>
module attributes {stable_mosaic.version = 11 : i64} {
  func.func @gmm_logprob_kernel(%arg0: i32, %arg1: memref<128x32xf32, #tpu.memory_space<vmem>>, %arg2: memref<8x32xf32, #tpu.memory_space<vmem>>, %arg3: memref<8x32xf32, #tpu.memory_space<vmem>>, %arg4: memref<8x1xf32, #tpu.memory_space<vmem>>, %arg5: memref<1x128xf32, #tpu.memory_space<vmem>>) attributes {dimension_semantics = [#tpu.dimension_semantics<parallel>], iteration_bounds = array<i64: 1>, scalar_prefetch = 0 : i64, scratch_operands = 0 : i64, tpu.core_type = #tpu.core_type<tc>, window_params = [{transform_indices = @transform_0, window_bounds = array<i64: 128, 32>}, {pipeline_mode = #tpu.pipeline_mode<synchronous>, transform_indices = @transform_1, window_bounds = array<i64: 8, 32>}, {pipeline_mode = #tpu.pipeline_mode<synchronous>, transform_indices = @transform_2, window_bounds = array<i64: 8, 32>}, {pipeline_mode = #tpu.pipeline_mode<synchronous>, transform_indices = @transform_3, window_bounds = array<i64: 8, 1>}, {transform_indices = @transform_4, window_bounds = array<i64: 1, 128>}]} {
    %c0 = arith.constant 0 : index
    %c0_0 = arith.constant 0 : index
    %0 = vector.load %arg1[%c0, %c0_0] : memref<128x32xf32, #tpu.memory_space<vmem>>, vector<128x32xf32>
    %c0_1 = arith.constant 0 : index
    %c0_2 = arith.constant 0 : index
    %1 = vector.load %arg2[%c0_1, %c0_2] : memref<8x32xf32, #tpu.memory_space<vmem>>, vector<8x32xf32>
    %c0_3 = arith.constant 0 : index
    %c0_4 = arith.constant 0 : index
    %2 = vector.load %arg3[%c0_3, %c0_4] : memref<8x32xf32, #tpu.memory_space<vmem>>, vector<8x32xf32>
    %c0_5 = arith.constant 0 : index
    %c0_6 = arith.constant 0 : index
    %3 = vector.load %arg4[%c0_5, %c0_6] : memref<8x1xf32, #tpu.memory_space<vmem>>, vector<8x1xf32>
    %4 = arith.mulf %0, %0 : vector<128x32xf32>
    %cst = arith.constant dense<0.000000e+00> : vector<8x128xf32>
    %5 = tpu.matmul %1, %4, %cst {dimension_numbers = #tpu.dot_dimension_numbers<[1], [1], [0], [0], [0, 0, 1, 0], [], []>} : vector<8x32xf32>, vector<128x32xf32>, vector<8x128xf32> -> vector<8x128xf32>
    %cst_7 = arith.constant dense<0.000000e+00> : vector<8x128xf32>
    %6 = tpu.matmul %2, %0, %cst_7 {dimension_numbers = #tpu.dot_dimension_numbers<[1], [1], [0], [0], [0, 0, 1, 0], [], []>} : vector<8x32xf32>, vector<128x32xf32>, vector<8x128xf32> -> vector<8x128xf32>
    %cst_8 = arith.constant 2.000000e+00 : f32
    %7 = vector.broadcast %cst_8 : f32 to vector<8x128xf32>
    %8 = arith.mulf %7, %6 : vector<8x128xf32>
    %9 = arith.subf %5, %8 : vector<8x128xf32>
    %10 = vector.broadcast %3 : vector<8x1xf32> to vector<8x128xf32>
    %11 = arith.subf %10, %9 : vector<8x128xf32>
    %cst_9 = arith.constant dense<0xFF800000> : vector<128xf32>
    %12 = vector.multi_reduction <maximumf>, %11, %cst_9 [0] : vector<8x128xf32> to vector<128xf32>
    %13 = vector.shape_cast %12 : vector<128xf32> to vector<1x128xf32>
    %14 = vector.broadcast %13 : vector<1x128xf32> to vector<8x128xf32>
    %15 = arith.subf %11, %14 : vector<8x128xf32>
    %16 = math.exp %15 : vector<8x128xf32>
    %cst_10 = arith.constant dense<0.000000e+00> : vector<128xf32>
    %17 = vector.multi_reduction <add>, %16, %cst_10 [0] : vector<8x128xf32> to vector<128xf32>
    %18 = vector.shape_cast %17 : vector<128xf32> to vector<1x128xf32>
    %19 = math.log %18 : vector<1x128xf32>
    %20 = arith.addf %13, %19 : vector<1x128xf32>
    %c0_11 = arith.constant 0 : index
    %c0_12 = arith.constant 0 : index
    %21 = vector.load %arg5[%c0_11, %c0_12] : memref<1x128xf32, #tpu.memory_space<vmem>>, vector<1x128xf32>
    tpu.vector_store %arg5[%c0_11, %c0_12], %20 {strides = array<i32>} : memref<1x128xf32, #tpu.memory_space<vmem>>, vector<1x128xf32>,
    return
  }
  func.func @transform_0(%arg0: i32) -> (i32, i32) {
    %c0_i32 = arith.constant 0 : i32
    %c0_i32_0 = arith.constant 0 : i32
    return %arg0, %c0_i32 : i32, i32
  }
  func.func @transform_1(%arg0: i32) -> (i32, i32) {
    %c0_i32 = arith.constant 0 : i32
    %c0_i32_0 = arith.constant 0 : i32
    %c0_i32_1 = arith.constant 0 : i32
    return %c0_i32, %c0_i32_0 : i32, i32
  }
  func.func @transform_2(%arg0: i32) -> (i32, i32) {
    %c0_i32 = arith.constant 0 : i32
    %c0_i32_0 = arith.constant 0 : i32
    %c0_i32_1 = arith.constant 0 : i32
    return %c0_i32, %c0_i32_0 : i32, i32
  }
  func.func @transform_3(%arg0: i32) -> (i32, i32) {
    %c0_i32 = arith.constant 0 : i32
    %c0_i32_0 = arith.constant 0 : i32
    %c0_i32_1 = arith.constant 0 : i32
    return %c0_i32, %c0_i32_0 : i32, i32
  }
  func.func @transform_4(%arg0: i32) -> (i32, i32) {
    %c0_i32 = arith.constant 0 : i32
    %c0_i32_0 = arith.constant 0 : i32
    return %c0_i32, %arg0 : i32, i32
  }
}

</mosaic_0001>

<bundles_post_ra>
// kernel: tpu_custom_call.1
= control target key start
LH: loop header
LB: loop body
LE: loop exit
PB: predicated region body
PF: predicated region fallthrough
CT: control target
= control target key end

     0   :  { %vm53_vm0 = vcmask 261120   ;;  %v573_v2 = vmov 0.0|0.0   ;;  %vm574_vm2 = vmmov 0   ;;  %v575_v9 = vmov 0.0   ;;  %s728_s0 = inlined_call_operand.vmem [shape: f32[128,32], index: 0, kind: input, shape index: {}]   ;;  %s729_s1 = inlined_call_operand.vmem [shape: f32[8,32], index: 1, kind: input, shape index: {}]   ;;  %s730_s2 = inlined_call_operand.vmem [shape: f32[8,32], index: 2, kind: input, shape index: {}]   ;;  %s731_s3 = inlined_call_operand.vmem [shape: f32[8,1], index: 3, kind: input, shape index: {}]   ;;  %s732_s4 = inlined_call_operand.hbm [shape: f32[1,128], index: 4, kind: output, shape index: {}]  }
   0x1   :  { %v18_v0 = vld [vmem:[%s728_s0] sm:$0xff]  ;;  %v19_v1 = vld [vmem:[%s728_s0 + $0x8] sm:$0xff]  ;;  %507 = vmatprep.subr.bf16.mxu1 %v573_v2  ;;  %vm612_vm1 = vmpackc.low %vm53_vm0, %vm53_vm0  ;;  %475 = vmatprep.subr.bf16.mxu0 %v573_v2 }
   0x2   :  { %v508_v4 = vpack.c.bf16 %v19_v1, %v18_v0  ;;  %v37_v5 = vmul.f32 %v18_v0, %v18_v0  ;;  %v38_v6 = vmul.f32 %v19_v1, %v19_v1  ;;  %v20_v7 = vld [vmem:[%s728_s0 + $0x10] sm:$0xff]  ;;  %v21_v8 = vld [vmem:[%s728_s0 + $0x18] sm:$0xff]  ;;  %472 = vmatprep.mubr.msk.f32.mxu1 %vm574_vm2, %v575_v9 }
   0x3   :  { %v39_v11 = vmul.f32 %v20_v7, %v20_v7  ;;  %v40_v12 = vmul.f32 %v21_v8, %v21_v8 }
   0x4   :  { %510 = vmatpush3.bf16.xpose.msk.msra.mxu1 %vm612_vm1, %v508_v4  ;;  %v476_v10 = vpack.c.bf16 %v38_v6, %v37_v5 }
   0x5   :  { %511 = vmatprep.subr.bf16.mxu1 %v573_v2 }
   0x6   :  { %478 = vmatpush3.bf16.xpose.msk.msra.mxu0 %vm612_vm1, %v476_v10 }
   0x7   :  { %479 = vmatprep.subr.bf16.mxu0 %v573_v2 }
   0x8   :  { %9 = vsyncpa [#allocation3], 0  ;;  %v512_v13 = vpack.c.bf16 %v21_v8, %v20_v7  ;;  %437 = vmatprep.mubr.msk.f32.mxu0 %vm574_vm2, %v575_v9  ;;  %v36_v14 = vld [vmem:[%s731_s3] sm:$0xff]  ;;  %v480_v15 = vpack.c.bf16 %v40_v12, %v39_v11  ;;  %v576_v16 = vmov 0   ;;  %v23_v18 = vld [vmem:[%s728_s0 + $0x28] sm:$0xff] }
   0x9   :  { %544 = vset.pattern.permute.xlu0 %v576_v16  ;;  %v22_v17 = vld [vmem:[%s728_s0 + $0x20] sm:$0xff]  ;;  %v42_v20 = vmul.f32 %v23_v18, %v23_v18  ;;  %v24_v23 = vld [vmem:[%s728_s0 + $0x30] sm:$0xff]  ;;  %v25_v24 = vld [vmem:[%s728_s0 + $0x38] sm:$0xff] }
   0xa   :  { %300 = vperm.xlu0 %544, %v36_v14   ;;  %v41_v19 = vmul.f32 %v22_v17, %v22_v17  ;;  %v516_v21 = vpack.c.bf16 %v23_v18, %v22_v17  ;;  %v43_v25 = vmul.f32 %v24_v23, %v24_v23  ;;  %v44_v26 = vmul.f32 %v25_v24, %v25_v24  ;;  %v26_v29 = vld [vmem:[%s728_s0 + $0x40] sm:$0xff]  ;;  %v27_v30 = vld [vmem:[%s728_s0 + $0x48] sm:$0xff]  ;;  %v28_v35 = vld [vmem:[%s728_s0 + $0x50] sm:$0xff] }
   0xb   :  { %v520_v27 = vpack.c.bf16 %v25_v24, %v24_v23  ;;  %v45_v31 = vmul.f32 %v26_v29, %v26_v29  ;;  %v46_v32 = vmul.f32 %v27_v30, %v27_v30  ;;  %v524_v33 = vpack.c.bf16 %v27_v30, %v26_v29  ;;  %v29_v36 = vld [vmem:[%s728_s0 + $0x58] sm:$0xff]  ;;  %v30_v41 = vld [vmem:[%s728_s0 + $0x60] sm:$0xff]  ;;  %v31_v42 = vld [vmem:[%s728_s0 + $0x68] sm:$0xff] }
   0xc   :  { %514 = vmatpush3.bf16.xpose.msk.msra.mxu1 %vm612_vm1, %v512_v13  ;;  %v484_v22 = vpack.c.bf16 %v42_v20, %v41_v19  ;;  %v488_v28 = vpack.c.bf16 %v44_v26, %v43_v25  ;;  %v47_v37 = vmul.f32 %v28_v35, %v28_v35  ;;  %v48_v38 = vmul.f32 %v29_v36, %v29_v36  ;;  %v32_v47 = vld [vmem:[%s728_s0 + $0x70] sm:$0xff]  ;;  %v33_v48 = vld [vmem:[%s728_s0 + $0x78] sm:$0xff]  ;;  %v35_v53 = vld [vmem:[%s730_s2] sm:$0xff] }
   0xd   :  { %515 = vmatprep.subr.bf16.mxu1 %v573_v2  ;;  %v492_v34 = vpack.c.bf16 %v46_v32, %v45_v31  ;;  %v528_v39 = vpack.c.bf16 %v29_v36, %v28_v35  ;;  %v49_v43 = vmul.f32 %v30_v41, %v30_v41  ;;  %v50_v44 = vmul.f32 %v31_v42, %v31_v42  ;;  %v34_v54 = vld [vmem:[%s729_s1] sm:$0xff]  ;;  %s577_s1 = smov [#allocation2]  }
   0xe   :  { %482 = vmatpush3.bf16.xpose.msk.msra.mxu0 %vm612_vm1, %v480_v15  ;;  %v496_v40 = vpack.c.bf16 %v48_v38, %v47_v37  ;;  %v532_v45 = vpack.c.bf16 %v31_v42, %v30_v41  ;;  %v51_v49 = vmul.f32 %v32_v47, %v32_v47  ;;  %v52_v50 = vmul.f32 %v33_v48, %v33_v48  ;;  %s329_s2 = sshll.u32 %s577_s1, 4  ;;  %s330_s2 = int_to_ptr.vmem [resolvable:$true] %s329_s2 }
   0xf   :  { %483 = vmatprep.subr.bf16.mxu0 %v573_v2  ;;  %v500_v46 = vpack.c.bf16 %v50_v44, %v49_v43  ;;  %v536_v51 = vpack.c.bf16 %v33_v48, %v32_v47  ;;  %s549_s25 = scalar_lea.vmem %s330_s2, 16  ;;  %s553_s26 = scalar_lea.vmem %s330_s2, 32 }
  0x10   :  { %v504_v52 = vpack.c.bf16 %v52_v50, %v51_v49  ;;  %p550_p0 = scmp.ne.s32.totalorder %s330_s2, %s549_s25  ;;  %p554_p1 = scmp.lt.s32.totalorder %s330_s2, %s330_s2 }
  0x11   :  { %p555_p2 = scmp.lt.s32.totalorder %s553_s26, %s549_s25 }
  0x13   :  { %p556_p3 = por %p555_p2, %p554_p1 }
  0x14   :  { %518 = vmatpush3.bf16.xpose.msk.msra.mxu1 %vm612_vm1, %v516_v21 }
  0x15   :  { %519 = vmatprep.subr.bf16.mxu1 %v573_v2  ;;  %p557_p4 = pnand %p556_p3, %p550_p0 }
  0x16   :  { %486 = vmatpush3.bf16.xpose.msk.msra.mxu0 %vm612_vm1, %v484_v22 }
  0x17   :  { %487 = vmatprep.subr.bf16.mxu0 %v573_v2 }
  0x1c   :  { %522 = vmatpush3.bf16.xpose.msk.msra.mxu1 %vm612_vm1, %v520_v27 }
  0x1d   :  { %523 = vmatprep.subr.bf16.mxu1 %v573_v2 }
  0x1e   :  { %490 = vmatpush3.bf16.xpose.msk.msra.mxu0 %vm612_vm1, %v488_v28 }
  0x1f   :  { %491 = vmatprep.subr.bf16.mxu0 %v573_v2 }
  0x24   :  { %526 = vmatpush3.bf16.xpose.msk.msra.mxu1 %vm612_vm1, %v524_v33 }
  0x25   :  { %527 = vmatprep.subr.bf16.mxu1 %v573_v2 }
  0x26   :  { %494 = vmatpush3.bf16.xpose.msk.msra.mxu0 %vm612_vm1, %v492_v34 }
  0x27   :  { %495 = vmatprep.subr.bf16.mxu0 %v573_v2 }
  0x2c   :  { %530 = vmatpush3.bf16.xpose.msk.msra.mxu1 %vm612_vm1, %v528_v39 }
  0x2d   :  { %531 = vmatprep.subr.bf16.mxu1 %v573_v2 }
  0x2e   :  { %498 = vmatpush3.bf16.xpose.msk.msra.mxu0 %vm612_vm1, %v496_v40 }
  0x2f   :  { %499 = vmatprep.subr.bf16.mxu0 %v573_v2 }
  0x34   :  { %534 = vmatpush3.bf16.xpose.msk.msra.mxu1 %vm612_vm1, %v532_v45 }
  0x35   :  { %535 = vmatprep.subr.bf16.mxu1 %v573_v2 }
  0x36   :  { %502 = vmatpush3.bf16.xpose.msk.msra.mxu0 %vm612_vm1, %v500_v46 }
  0x37   :  { %503 = vmatprep.subr.bf16.mxu0 %v573_v2 }
  0x3c   :  { %538 = vmatpush3.bf16.xpose.msk.msra.mxu1 %vm612_vm1, %v536_v51 }
  0x3e   :  { %506 = vmatpush3.bf16.xpose.msk.msra.mxu0 %vm612_vm1, %v504_v52 }
  0x43   :  { %473 = vmatmul.mubr.msk.f32.vlgmr.msra.gmra.mrb[0].mxu1 %vm53_vm0, %v35_v53 }
  0x45   :  { %438 = vmatmul.mubr.msk.f32.vlgmr.msra.gmra.mrb[0].mxu0 %vm53_vm0, %v34_v54 }
  0x89   :  { %v301_v59 = vpop.permute.xlu0 %300 }
 0x116   :  { %v292_v55 = vpop.f32.mrb[0].mxu1 }
 0x117   :  { %v296_v56 = vmul.f32 2.0, %v292_v55  ;;  %v474_v57 = vpop.f32.mrb[1].mxu1 }
 0x118   :  { %v171_v58 = vpop.f32.mrb[0].mxu0 }
 0x119   :  { %v297_v60 = vsub.f32 %v171_v58, %v296_v56  ;;  %v439_v61 = vpop.f32.mrb[1].mxu0 }
 0x11b   :  { %v303_v62 = vsub.f32 %v301_v59, %v297_v60 }
 0x11d   :  { %v304_v63 = vrot.slane %v303_v62, 4 }
 0x11f   :  { %v305_v0 = vmax.f32 %v303_v62, %v304_v63 }
 0x121   :  { %v306_v1 = vrot.slane %v305_v0, 2 }
 0x123   :  { %v307_v2 = vmax.f32 %v305_v0, %v306_v1 }
 0x125   :  { %v308_v3 = vrot.slane %v307_v2, 1 }
 0x127   :  { %v309_v4 = vmax.f32 %v307_v2, %v308_v3 }
 0x129   :  { %v310_v5 = vsub.f32 %v303_v62, %v309_v4 }
 0x12b   :  { %v311_v6 = vmul.f32 1.442695, %v310_v5 }
 0x12d   :  { %545 = vpow2.f32 %v311_v6 }
 0x137   :  { %v546_v7 = vpop.eup %545 }
 0x138   :  { %v313_v8 = vrot.slane %v546_v7, 4 }
 0x13a   :  { %v314_v9 = vadd.f32 %v546_v7, %v313_v8 }
 0x13c   :  { %v315_v10 = vrot.slane %v314_v9, 2 }
 0x13e   :  { %v316_v11 = vadd.f32 %v315_v10, %v314_v9 }
 0x140   :  { %v317_v12 = vrot.slane %v316_v11, 1 }
 0x142   :  { %v318_v13 = vadd.f32 %v317_v12, %v316_v11 }
 0x144   :  { %547 = vlog2.f32 %v318_v13 }
 0x14e   :  { %v548_v14 = vpop.eup %547 }
 0x14f   :  { %v320_v15 = vmul.f32 0.6931472, %v548_v14 }
 0x151   :  { %v321_v16 = vadd.f32 %v320_v15, %v309_v4 }
 0x153   :  { %322 = vst [vmem:[#allocation2] sm:$0x1] %v321_v16 }
 0x154   :  { %560 = shalt.err (!%p557_p4)
}
 0x155   :  { %s561_s3 = scalar_lea.hbm %s732_s4, 16 }
 0x156   :  { %p562_p5 = scmp.ne.s32.totalorder %s732_s4, %s561_s3  ;;  %p565_p6 = scmp.lt.u32.totalorder %s561_s3, %s732_s4 }
 0x158   :  { %p567_p7 = pnand %p565_p6, %p562_p5 }
 0x15a   :  { %570 = shalt.err (!%p567_p7)
}
 0x15b   :  { %332 = dma.vmem_to_hbm [thread:$0]  %s330_s2, 16, %s732_s4, [#allocation3]  }
 0x15c   :  { %571 = dma.done.wait [#allocation3], 16  }
 0x15d   :  { %572 = vsyncadd [#allocation3], 4294967280 }
 0x15e   :  { %336 = vsyncpa [#allocation3], 1 }

</bundles_post_ra>
